<compile_context>
chip_gen: v6e
topology: v6e:2x2x1
jax: 0.10.0
libtpu: 0.0.40
codegen_flags: <defaults>
</compile_context>

<pallas_src>
import functools

import jax
import jax.numpy as jnp
from jax import lax
from jax.experimental import pallas as pl
from jax.experimental.pallas import tpu as pltpu

_LANE = 128
_SUBLANE = 8
_DEFAULT_BATCH_TILE = 1024   # tuned constant; sweep 512-2048 for huge batches


def _round_up(x, m):
    return ((int(x) + m - 1) // m) * m


def _layernorm_fused(x, eps=1e-5):
    # Single-pass LayerNorm over the feature (lane) axis.
    # Matches nn.LayerNorm(dim, elementwise_affine=False): biased variance,
    # eps inside the sqrt.  var = E[x^2] - mean^2, clamped at 0.
    # NOTE: fine with f32 sums and O(1) activations (post-Linear, normalized
    # obs); switch to the two-pass form if |mean| >> std ever becomes real.
    n = x.shape[-1]
    inv_n = 1.0 / float(n)
    s1 = jnp.sum(x, axis=-1, keepdims=True)
    s2 = jnp.sum(x * x, axis=-1, keepdims=True)
    mean = s1 * inv_n
    var = jnp.maximum(s2 * inv_n - mean * mean, 0.0)
    return (x - mean) * lax.rsqrt(var + eps)


def _actor_kernel(obs_ref, w1_ref, b1_ref, w2_ref, b2_ref, w3_ref, b3_ref,
                  out_ref, *, act_limit):
    x = obs_ref[...]                       # (tb, obs_dim) in compute_dtype

    # hidden layer 1: Linear -> LayerNorm -> ReLU   (f32 accumulation)
    h = jnp.dot(x, w1_ref[...], preferred_element_type=jnp.float32) + b1_ref[...]
    h = jnp.maximum(_layernorm_fused(h), 0.0)

    # hidden layer 2: Linear -> LayerNorm -> ReLU
    h = jnp.dot(h.astype(w2_ref.dtype), w2_ref[...],
                preferred_element_type=jnp.float32) + b2_ref[...]
    h = jnp.maximum(_layernorm_fused(h), 0.0)

    # output layer: Linear -> Tanh, scale by act_limit
    y = jnp.dot(h.astype(w3_ref.dtype), w3_ref[...],
                preferred_element_type=jnp.float32) + b3_ref[...]
    out_ref[...] = (act_limit * jnp.tanh(y)).astype(out_ref.dtype)


def mlp_actor_forward(obs, params, act_limit, *,
                      compute_dtype=jnp.float32,
                      out_dtype=jnp.float32,
                      batch_tile=_DEFAULT_BATCH_TILE):
    """Forward pass of MLPActor.  obs: (B, obs_dim) or (obs_dim,).

    compute_dtype: dtype of the streamed obs tile and the weights (bf16 gives
      native-rate MXU matmuls + half the HBM stream; accumulation stays f32).
    out_dtype: dtype of the action output written back to HBM.
    batch_tile: max rows per grid step (tuned constant, sweep 512-2048).
    """
    squeeze = obs.ndim == 1
    if squeeze:
        obs = obs[None, :]
    B, obs_dim = obs.shape
    w1, b1, w2, b2, w3, b3 = params
    act_dim = w3.shape[1]

    # --- batch tiling: minimize padding, guarantee >=2 steps when worthwhile
    n_steps = max(1, -(-B // int(batch_tile)))          # ceil(B / batch_tile)
    if n_steps == 1 and B >= 2 * _SUBLANE:
        n_steps = 2          # v7x: one step per TensorCore; also enables pipelining
    tb = _round_up(-(-B // n_steps), _SUBLANE)           # equal split, 8-aligned
    n_steps = -(-B // tb)
    b_pad = n_steps * tb

    # --- obs preprocessing: at most one cast (skipped if no-op) + one pad ----
    obs_c = obs if obs.dtype == compute_dtype else obs.astype(compute_dtype)
    if b_pad != B:
        obs_c = jnp.pad(obs_c, ((0, b_pad - B), (0, 0)))

    # --- weights streamed in compute_dtype, biases/elementwise in f32 --------
    def cast(a, dt):
        return a if a.dtype == dt else a.astype(dt)
    w1c, w2c, w3c = (cast(w, compute_dtype) for w in (w1, w2, w3))
    b1f, b2f, b3f = (cast(b, jnp.float32) for b in (b1, b2, b3))

    # --- VMEM headroom: only set an explicit limit if we'd trip the v5e 16MiB
    comp_isz = jnp.dtype(compute_dtype).itemsize
    out_isz = jnp.dtype(out_dtype).itemsize
    lane = lambda n: _round_up(max(n, 1), _LANE)
    sub = lambda n: _round_up(max(n, 1), _SUBLANE)
    w_bytes = sum(sub(w.shape[0]) * lane(w.shape[1]) * comp_isz
                  for w in (w1c, w2c, w3c))
    b_bytes = sum(_SUBLANE * lane(b.shape[-1]) * 4 for b in (b1f, b2f, b3f))
    io_bytes = 2 * tb * (lane(obs_dim) * comp_isz + lane(act_dim) * out_isz)
    act_bytes = 4 * tb * lane(max(w1.shape[1], w2.shape[1])) * 4
    est = 2 * (w_bytes + b_bytes) + io_bytes + act_bytes
    vmem_limit = None if est < (12 << 20) else min(2 * est, 64 << 20)

    cp_kwargs = dict(dimension_semantics=("parallel",))
    if vmem_limit is not None:
        cp_kwargs["vmem_limit_bytes"] = int(vmem_limit)

    def resident(shape):
        # whole array, same block every grid step -> stays VMEM-resident
        return pl.BlockSpec(shape, lambda i, _s=len(shape): (0,) * _s)

    kernel = functools.partial(_actor_kernel, act_limit=float(act_limit))
    out = pl.pallas_call(
        kernel,
        out_shape=jax.ShapeDtypeStruct((b_pad, act_dim), out_dtype),
        grid_spec=pltpu.PrefetchScalarGridSpec(
            num_scalar_prefetch=0,
            grid=(n_steps,),
            in_specs=[
                pl.BlockSpec((tb, obs_dim), lambda i: (i, 0)),
                resident(w1c.shape), resident(b1f.shape),
                resident(w2c.shape), resident(b2f.shape),
                resident(w3c.shape), resident(b3f.shape),
            ],
            # last dim == full array dim (act_dim) -> no 128-lane write
            # amplification; masked vst is cheaper than 32x the HBM bytes.
            out_specs=pl.BlockSpec((tb, act_dim), lambda i: (i, 0)),
        ),
        compiler_params=pltpu.CompilerParams(**cp_kwargs),
    )(obs_c, w1c, b1f, w2c, b2f, w3c, b3f)

    out = out[:B]
    if squeeze:
        out = jnp.squeeze(out, axis=0)
        if act_dim == 1:
            # mirror torch .squeeze(), which drops ALL size-1 dims
            out = jnp.squeeze(out, axis=-1)
    return out


def init_params(key, obs_dim, hidden_sizes, act_dim):
    """Deterministic init matching torch.nn.Linear default (uniform +/- 1/sqrt(fan_in)).
    Weights stored transposed: (in_features, out_features)."""
    sizes = [obs_dim] + list(hidden_sizes) + [act_dim]
    params = []
    for j in range(len(sizes) - 1):
        fan_in, fan_out = sizes[j], sizes[j + 1]
        key, kw, kb = jax.random.split(key, 3)
        bound = 1.0 / jnp.sqrt(jnp.float32(fan_in))
        w = jax.random.uniform(kw, (fan_in, fan_out), jnp.float32, -bound, bound)
        b = jax.random.uniform(kb, (1, fan_out), jnp.float32, -bound, bound)
        params += [w, b]
    return params


def _layernorm_ref(x, eps=1e-5):
    mean = jnp.mean(x, axis=-1, keepdims=True)
    var = jnp.mean((x - mean) ** 2, axis=-1, keepdims=True)
    return (x - mean) * lax.rsqrt(var + eps)


def reference_forward(obs, params, act_limit):
    """Pure-JAX reference (two-pass LayerNorm, f32) for correctness check."""
    squeeze = obs.ndim == 1
    if squeeze:
        obs = obs[None, :]
    w1, b1, w2, b2, w3, b3 = params
    h = obs @ w1 + b1
    h = jnp.maximum(_layernorm_ref(h), 0.0)
    h = h @ w2 + b2
    h = jnp.maximum(_layernorm_ref(h), 0.0)
    y = act_limit * jnp.tanh(h @ w3 + b3)
    if squeeze:
        y = jnp.squeeze(y)
    return y


if __name__ == "__main__":
    key = jax.random.PRNGKey(0)
    obs_dim, act_dim = 16, 4
    hidden_sizes = (32, 32)
    act_limit = 2.0
    batch = 2

    kp, kx, kx2 = jax.random.split(key, 3)
    params = init_params(kp, obs_dim, hidden_sizes, act_dim)
    obs = jax.random.normal(kx, (batch, obs_dim), jnp.float32)
    ref = reference_forward(obs, params, act_limit)

    # f32 path, small batch (grid=(1,), tb=8)
    out = mlp_actor_forward(obs, params, act_limit)
    jax.block_until_ready(out)
    assert out.shape == (batch, act_dim)
    assert jnp.allclose(out, ref, atol=1e-4, rtol=1e-4), (out, ref)

    # 1-D obs path (unsqueeze/squeeze semantics)
    out1d = mlp_actor_forward(obs[0], params, act_limit)
    jax.block_until_ready(out1d)
    assert out1d.shape == (act_dim,)
    assert jnp.allclose(out1d, ref[0], atol=1e-4, rtol=1e-4)

    # pad-minimizing multi-step grid: B=300, batch_tile=256 -> 2 x 152 rows
    obs_big = jax.random.normal(kx2, (300, obs_dim), jnp.float32)
    ref_big = reference_forward(obs_big, params, act_limit)
    out_big = mlp_actor_forward(obs_big, params, act_limit, batch_tile=256)
    jax.block_until_ready(out_big)
    assert out_big.shape == (300, act_dim)
    assert jnp.allclose(out_big, ref_big, atol=1e-4, rtol=1e-4), (
        jnp.max(jnp.abs(out_big - ref_big)))

    # default tile (1024) still forces 2 grid steps (one per v7x TensorCore),
    # bf16 streaming + bf16 writeback path
    out_bf16 = mlp_actor_forward(obs_big, params, act_limit,
                                 compute_dtype=jnp.bfloat16,
                                 out_dtype=jnp.bfloat16)
    jax.block_until_ready(out_bf16)
    assert out_bf16.shape == (300, act_dim)
    assert jnp.allclose(out_bf16.astype(jnp.float32), ref_big, atol=5e-2), (
        jnp.max(jnp.abs(out_bf16.astype(jnp.float32) - ref_big)))

    print("KERNEL_OK")
</pallas_src>

<mosaic_0001>
module attributes {stable_mosaic.version = 11 : i64} {
  func.func @_actor_kernel(%arg0: i32, %arg1: memref<8x16xf32, #tpu.memory_space<vmem>>, %arg2: memref<16x32xf32, #tpu.memory_space<vmem>>, %arg3: memref<1x32xf32, #tpu.memory_space<vmem>>, %arg4: memref<32x32xf32, #tpu.memory_space<vmem>>, %arg5: memref<1x32xf32, #tpu.memory_space<vmem>>, %arg6: memref<32x4xf32, #tpu.memory_space<vmem>>, %arg7: memref<1x4xf32, #tpu.memory_space<vmem>>, %arg8: memref<8x4xf32, #tpu.memory_space<vmem>>) attributes {dimension_semantics = [#tpu.dimension_semantics<parallel>], iteration_bounds = array<i64: 1>, scalar_prefetch = 0 : i64, scratch_operands = 0 : i64, tpu.core_type = #tpu.core_type<tc>, window_params = [{transform_indices = @transform_0, window_bounds = array<i64: 8, 16>}, {pipeline_mode = #tpu.pipeline_mode<synchronous>, transform_indices = @transform_1, window_bounds = array<i64: 16, 32>}, {pipeline_mode = #tpu.pipeline_mode<synchronous>, transform_indices = @transform_2, window_bounds = array<i64: 1, 32>}, {pipeline_mode = #tpu.pipeline_mode<synchronous>, transform_indices = @transform_3, window_bounds = array<i64: 32, 32>}, {pipeline_mode = #tpu.pipeline_mode<synchronous>, transform_indices = @transform_4, window_bounds = array<i64: 1, 32>}, {pipeline_mode = #tpu.pipeline_mode<synchronous>, transform_indices = @transform_5, window_bounds = array<i64: 32, 4>}, {pipeline_mode = #tpu.pipeline_mode<synchronous>, transform_indices = @transform_6, window_bounds = array<i64: 1, 4>}, {transform_indices = @transform_7, window_bounds = array<i64: 8, 4>}]} {
    %c0 = arith.constant 0 : index
    %c0_0 = arith.constant 0 : index
    %0 = vector.load %arg1[%c0, %c0_0] : memref<8x16xf32, #tpu.memory_space<vmem>>, vector<8x16xf32>
    %c0_1 = arith.constant 0 : index
    %c0_2 = arith.constant 0 : index
    %1 = vector.load %arg2[%c0_1, %c0_2] : memref<16x32xf32, #tpu.memory_space<vmem>>, vector<16x32xf32>
    %cst = arith.constant dense<0.000000e+00> : vector<8x32xf32>
    %2 = tpu.matmul %0, %1, %cst {dimension_numbers = #tpu.dot_dimension_numbers<[1], [0], [0], [1], [0, 0, 1, 1], [], []>} : vector<8x16xf32>, vector<16x32xf32>, vector<8x32xf32> -> vector<8x32xf32>
    %c0_3 = arith.constant 0 : index
    %c0_4 = arith.constant 0 : index
    %3 = vector.load %arg3[%c0_3, %c0_4] : memref<1x32xf32, #tpu.memory_space<vmem>>, vector<1x32xf32>
    %4 = vector.broadcast %3 : vector<1x32xf32> to vector<8x32xf32>
    %5 = arith.addf %2, %4 : vector<8x32xf32>
    %cst_5 = arith.constant dense<0.000000e+00> : vector<8xf32>
    %6 = vector.multi_reduction <add>, %5, %cst_5 [1] : vector<8x32xf32> to vector<8xf32>
    %7 = vector.shape_cast %6 : vector<8xf32> to vector<8x1xf32>
    %8 = arith.mulf %5, %5 : vector<8x32xf32>
    %cst_6 = arith.constant dense<0.000000e+00> : vector<8xf32>
    %9 = vector.multi_reduction <add>, %8, %cst_6 [1] : vector<8x32xf32> to vector<8xf32>
    %10 = vector.shape_cast %9 : vector<8xf32> to vector<8x1xf32>
    %cst_7 = arith.constant 3.125000e-02 : f32
    %11 = vector.broadcast %cst_7 : f32 to vector<8x1xf32>
    %12 = arith.mulf %7, %11 : vector<8x1xf32>
    %cst_8 = arith.constant 3.125000e-02 : f32
    %13 = vector.broadcast %cst_8 : f32 to vector<8x1xf32>
    %14 = arith.mulf %10, %13 : vector<8x1xf32>
    %15 = arith.mulf %12, %12 : vector<8x1xf32>
    %16 = arith.subf %14, %15 : vector<8x1xf32>
    %cst_9 = arith.constant 0.000000e+00 : f32
    %17 = vector.broadcast %cst_9 : f32 to vector<8x1xf32>
    %18 = arith.maximumf %16, %17 : vector<8x1xf32>
    %19 = vector.broadcast %12 : vector<8x1xf32> to vector<8x32xf32>
    %20 = arith.subf %5, %19 : vector<8x32xf32>
    %cst_10 = arith.constant 9.99999974E-6 : f32
    %21 = vector.broadcast %cst_10 : f32 to vector<8x1xf32>
    %22 = arith.addf %18, %21 : vector<8x1xf32>
    %23 = math.rsqrt %22 : vector<8x1xf32>
    %24 = vector.broadcast %23 : vector<8x1xf32> to vector<8x32xf32>
    %25 = arith.mulf %20, %24 : vector<8x32xf32>
    %cst_11 = arith.constant 0.000000e+00 : f32
    %26 = vector.broadcast %cst_11 : f32 to vector<8x32xf32>
    %27 = arith.maximumf %25, %26 : vector<8x32xf32>
    %c0_12 = arith.constant 0 : index
    %c0_13 = arith.constant 0 : index
    %28 = vector.load %arg4[%c0_12, %c0_13] : memref<32x32xf32, #tpu.memory_space<vmem>>, vector<32x32xf32>
    %cst_14 = arith.constant dense<0.000000e+00> : vector<8x32xf32>
    %29 = tpu.matmul %27, %28, %cst_14 {dimension_numbers = #tpu.dot_dimension_numbers<[1], [0], [0], [1], [0, 0, 1, 1], [], []>} : vector<8x32xf32>, vector<32x32xf32>, vector<8x32xf32> -> vector<8x32xf32>
    %c0_15 = arith.constant 0 : index
    %c0_16 = arith.constant 0 : index
    %30 = vector.load %arg5[%c0_15, %c0_16] : memref<1x32xf32, #tpu.memory_space<vmem>>, vector<1x32xf32>
    %31 = vector.broadcast %30 : vector<1x32xf32> to vector<8x32xf32>
    %32 = arith.addf %29, %31 : vector<8x32xf32>
    %cst_17 = arith.constant dense<0.000000e+00> : vector<8xf32>
    %33 = vector.multi_reduction <add>, %32, %cst_17 [1] : vector<8x32xf32> to vector<8xf32>
    %34 = vector.shape_cast %33 : vector<8xf32> to vector<8x1xf32>
    %35 = arith.mulf %32, %32 : vector<8x32xf32>
    %cst_18 = arith.constant dense<0.000000e+00> : vector<8xf32>
    %36 = vector.multi_reduction <add>, %35, %cst_18 [1] : vector<8x32xf32> to vector<8xf32>
    %37 = vector.shape_cast %36 : vector<8xf32> to vector<8x1xf32>
    %cst_19 = arith.constant 3.125000e-02 : f32
    %38 = vector.broadcast %cst_19 : f32 to vector<8x1xf32>
    %39 = arith.mulf %34, %38 : vector<8x1xf32>
    %cst_20 = arith.constant 3.125000e-02 : f32
    %40 = vector.broadcast %cst_20 : f32 to vector<8x1xf32>
    %41 = arith.mulf %37, %40 : vector<8x1xf32>
    %42 = arith.mulf %39, %39 : vector<8x1xf32>
    %43 = arith.subf %41, %42 : vector<8x1xf32>
    %cst_21 = arith.constant 0.000000e+00 : f32
    %44 = vector.broadcast %cst_21 : f32 to vector<8x1xf32>
    %45 = arith.maximumf %43, %44 : vector<8x1xf32>
    %46 = vector.broadcast %39 : vector<8x1xf32> to vector<8x32xf32>
    %47 = arith.subf %32, %46 : vector<8x32xf32>
    %cst_22 = arith.constant 9.99999974E-6 : f32
    %48 = vector.broadcast %cst_22 : f32 to vector<8x1xf32>
    %49 = arith.addf %45, %48 : vector<8x1xf32>
    %50 = math.rsqrt %49 : vector<8x1xf32>
    %51 = vector.broadcast %50 : vector<8x1xf32> to vector<8x32xf32>
    %52 = arith.mulf %47, %51 : vector<8x32xf32>
    %cst_23 = arith.constant 0.000000e+00 : f32
    %53 = vector.broadcast %cst_23 : f32 to vector<8x32xf32>
    %54 = arith.maximumf %52, %53 : vector<8x32xf32>
    %c0_24 = arith.constant 0 : index
    %c0_25 = arith.constant 0 : index
    %55 = vector.load %arg6[%c0_24, %c0_25] : memref<32x4xf32, #tpu.memory_space<vmem>>, vector<32x4xf32>
    %cst_26 = arith.constant dense<0.000000e+00> : vector<8x4xf32>
    %56 = tpu.matmul %54, %55, %cst_26 {dimension_numbers = #tpu.dot_dimension_numbers<[1], [0], [0], [1], [0, 0, 1, 1], [], []>} : vector<8x32xf32>, vector<32x4xf32>, vector<8x4xf32> -> vector<8x4xf32>
    %c0_27 = arith.constant 0 : index
    %c0_28 = arith.constant 0 : index
    %57 = vector.load %arg7[%c0_27, %c0_28] : memref<1x4xf32, #tpu.memory_space<vmem>>, vector<1x4xf32>
    %58 = vector.broadcast %57 : vector<1x4xf32> to vector<8x4xf32>
    %59 = arith.addf %56, %58 : vector<8x4xf32>
    %60 = math.tanh %59 : vector<8x4xf32>
    %cst_29 = arith.constant 2.000000e+00 : f32
    %61 = vector.broadcast %cst_29 : f32 to vector<8x4xf32>
    %62 = arith.mulf %61, %60 : vector<8x4xf32>
    %c0_30 = arith.constant 0 : index
    %c0_31 = arith.constant 0 : index
    %63 = vector.load %arg8[%c0_30, %c0_31] : memref<8x4xf32, #tpu.memory_space<vmem>>, vector<8x4xf32>
    tpu.vector_store %arg8[%c0_30, %c0_31], %62 {strides = array<i32>} : memref<8x4xf32, #tpu.memory_space<vmem>>, vector<8x4xf32>,
    return
  }
  func.func @transform_0(%arg0: i32) -> (i32, i32) {
    %c0_i32 = arith.constant 0 : i32
    %c0_i32_0 = arith.constant 0 : i32
    return %arg0, %c0_i32 : i32, i32
  }
  func.func @transform_1(%arg0: i32) -> (i32, i32) {
    %c0_i32 = arith.constant 0 : i32
    %c0_i32_0 = arith.constant 0 : i32
    %c0_i32_1 = arith.constant 0 : i32
    return %c0_i32, %c0_i32_0 : i32, i32
  }
  func.func @transform_2(%arg0: i32) -> (i32, i32) {
    %c0_i32 = arith.constant 0 : i32
    %c0_i32_0 = arith.constant 0 : i32
    %c0_i32_1 = arith.constant 0 : i32
    return %c0_i32, %c0_i32_0 : i32, i32
  }
  func.func @transform_3(%arg0: i32) -> (i32, i32) {
    %c0_i32 = arith.constant 0 : i32
    %c0_i32_0 = arith.constant 0 : i32
    %c0_i32_1 = arith.constant 0 : i32
    return %c0_i32, %c0_i32_0 : i32, i32
  }
  func.func @transform_4(%arg0: i32) -> (i32, i32) {
    %c0_i32 = arith.constant 0 : i32
    %c0_i32_0 = arith.constant 0 : i32
    %c0_i32_1 = arith.constant 0 : i32
    return %c0_i32, %c0_i32_0 : i32, i32
  }
  func.func @transform_5(%arg0: i32) -> (i32, i32) {
    %c0_i32 = arith.constant 0 : i32
    %c0_i32_0 = arith.constant 0 : i32
    %c0_i32_1 = arith.constant 0 : i32
    return %c0_i32, %c0_i32_0 : i32, i32
  }
  func.func @transform_6(%arg0: i32) -> (i32, i32) {
    %c0_i32 = arith.constant 0 : i32
    %c0_i32_0 = arith.constant 0 : i32
    %c0_i32_1 = arith.constant 0 : i32
    return %c0_i32, %c0_i32_0 : i32, i32
  }
  func.func @transform_7(%arg0: i32) -> (i32, i32) {
    %c0_i32 = arith.constant 0 : i32
    %c0_i32_0 = arith.constant 0 : i32
    return %arg0, %c0_i32 : i32, i32
  }
}

</mosaic_0001>

<bundles_post_ra>
// kernel: tpu_custom_call.1
= control target key start
LH: loop header
LB: loop body
LE: loop exit
PB: predicated region body
PF: predicated region fallthrough
CT: control target
= control target key end

     0   :  { %12 = vsyncpa [#allocation3], 0  ;;  %s560_s0 = inlined_call_operand.vmem [shape: f32[8,16], index: 0, kind: input, shape index: {}]   ;;  %s561_s1 = inlined_call_operand.hbm [shape: f32[16,32], index: 1, kind: input, shape index: {}]   ;;  %s562_s2 = inlined_call_operand.vmem [shape: f32[1,32], index: 2, kind: input, shape index: {}]   ;;  %s563_s3 = inlined_call_operand.vmem [shape: f32[32,32], index: 3, kind: input, shape index: {}]   ;;  %s564_s4 = inlined_call_operand.hbm [shape: f32[1,32], index: 4, kind: input, shape index: {}]   ;;  %s565_s5 = inlined_call_operand.vmem [shape: f32[32,4], index: 5, kind: input, shape index: {}]   ;;  %s566_s6 = inlined_call_operand.vmem [shape: f32[1,4], index: 6, kind: input, shape index: {}]   ;;  %s567_s7 = inlined_call_operand.vmem [shape: f32[8,4], index: 7, kind: output, shape index: {}]  }
   0x1   :  { %13 = vsyncpa [#allocation5], 0  ;;  %s453_s24 = smov [#allocation2]  }
   0x2   :  { %s21_s25 = sshll.u32 %s453_s24, 4  ;;  %s22_s25 = int_to_ptr.vmem [resolvable:$true] %s21_s25 }
   0x3   :  { %s417_s26 = scalar_lea.vmem %s22_s25, 256  ;;  %p422_p1 = scmp.lt.s32.totalorder %s22_s25, %s22_s25 }
   0x4   :  { %p418_p0 = scmp.ne.s32.totalorder %s22_s25, %s417_s26  ;;  %p423_p2 = scmp.lt.s32.totalorder %s417_s26, %s417_s26 }
   0x6   :  { %p424_p3 = por %p423_p2, %p422_p1 }
   0x8   :  { %p425_p4 = pnand %p424_p3, %p418_p0 }
   0xa   :  { %428 = shalt.err (!%p425_p4)
}
   0xb   :  { %s454_s27 = smov 128   ;;  %s455_s28 = smov 8  }
   0xc   :  { %27 = dma.hbm_to_vmem [thread:$0]  %s561_s1, 256, %s22_s25, [#allocation3], %s454_s27, %s454_s27, %s455_s28  }
   0xd   :  { %s456_s8 = smov [#allocation4]  }
   0xe   :  { %s38_s9 = sshll.u32 %s456_s8, 4  ;;  %s39_s9 = int_to_ptr.vmem [resolvable:$true] %s38_s9 }
   0xf   :  { %s437_s10 = scalar_lea.vmem %s39_s9, 16  ;;  %s441_s11 = scalar_lea.vmem %s39_s9, 32 }
  0x10   :  { %p438_p5 = scmp.ne.s32.totalorder %s39_s9, %s437_s10  ;;  %p442_p6 = scmp.lt.s32.totalorder %s39_s9, %s39_s9 }
  0x11   :  { %p443_p7 = scmp.lt.s32.totalorder %s441_s11, %s437_s10 }
  0x13   :  { %p444_p8 = por %p443_p7, %p442_p6 }
  0x15   :  { %p445_p9 = pnand %p444_p8, %p438_p5 }
  0x17   :  { %448 = shalt.err (!%p445_p9)
}
  0x18   :  { %41 = dma.hbm_to_vmem [thread:$0]  %s564_s4, 16, %s39_s9, [#allocation5]  }
  0x19   :  { %449 = dma.done.wait [#allocation3], 256  }
  0x1a   :  { %450 = vsyncadd [#allocation3], 4294967040 }
  0x1b   :  { %451 = dma.done.wait [#allocation5], 16  }
  0x1c   :  { %452 = vsyncadd [#allocation5], 4294967280  ;;  %v457_v0 = vmov 0.0   ;;  %vm458_vm0 = vmmov 0   ;;  %v54_v1 = vld [vmem:[#allocation2 + $0x8] sm:$0xff]  ;;  %v53_v2 = vld [vmem:[#allocation2] sm:$0xff] }
  0x1d   :  { %368 = vmatprep.subr.mxu0 %v457_v0  ;;  %372 = vmatprep.mubr.msk.f32.mxu0 %vm458_vm0, %v457_v0  ;;  %v52_v3 = vld [vmem:[%s560_s0] sm:$0xff]  ;;  %vm62_vm1 = vcmask 130048   ;;  %vm136_vm2 = vcmask 261120   ;;  %v157_v11 = vld [vmem:[%s563_s3 + $0x18] sm:$0xff]  ;;  %v156_v12 = vld [vmem:[%s563_s3 + $0x10] sm:$0xff]  ;;  %vm341_vm3 = vcmask 31744  }
  0x1e   :  { %375 = vmatprep.subr.mxu1 %v457_v0  ;;  %383 = vmatprep.mubr.msk.f32.mxu1 %vm458_vm0, %v457_v0  ;;  %v349_v4 = vld [vmem:[%s562_s2] ss:$0 sm:$0xff]  ;;  %v155_v13 = vld [vmem:[%s563_s3 + $0x8] sm:$0xff]  ;;  %v351_v27 = vld [vmem:[#allocation4] ss:$0 sm:$0xff] }
  0x1f   :  { %369 = vmatpush3.msra.mxu0 %v54_v1  ;;  %376 = vmatpush3.msra.mxu1 %v157_v11  ;;  %v154_v14 = vld [vmem:[%s563_s3] sm:$0xff]  ;;  %v258_v34 = vld [vmem:[%s565_s5 + $0x18] sm:$0xff]  ;;  %v257_v35 = vld [vmem:[%s565_s5 + $0x10] sm:$0xff] }
  0x20   :  { %370 = vmatprep.subr.mxu0 %v457_v0  ;;  %377 = vmatprep.subr.mxu1 %v457_v0  ;;  %v256_v36 = vld [vmem:[%s565_s5 + $0x8] sm:$0xff]  ;;  %v255_v37 = vld [vmem:[%s565_s5] sm:$0xff] }
  0x21   :  { %371 = vmatpush3.msra.mxu0 %v53_v2  ;;  %378 = vmatpush3.msra.mxu1 %v156_v12  ;;  %v353_v50 = vld [vmem:[%s566_s6] ss:$0 sm:$0xff] }
  0x22   :  { %373 = vmatmul.mubr.msk.f32.vlgmr.msra.gmra.mxu0 %vm62_vm1, %v52_v3  ;;  %386 = vmatprep.subr.mxu0 %v457_v0 }
  0x23   :  { %394 = vmatprep.mubr.msk.f32.mxu0 %vm458_vm0, %v457_v0  ;;  %379 = vmatprep.subr.mxu1 %v457_v0 }
  0x24   :  { %380 = vmatpush3.msra.mxu1 %v155_v13  ;;  %387 = vmatpush3.msra.mxu0 %v258_v34 }
  0x25   :  { %381 = vmatprep.subr.mxu1 %v457_v0  ;;  %388 = vmatprep.subr.mxu0 %v457_v0 }
  0x26   :  { %382 = vmatpush3.msra.mxu1 %v154_v14  ;;  %389 = vmatpush3.msra.mxu0 %v257_v35 }
  0x27   :  { %390 = vmatprep.subr.mxu0 %v457_v0 }
  0x28   :  { %391 = vmatpush3.msra.mxu0 %v256_v36 }
  0x29   :  { %392 = vmatprep.subr.mxu0 %v457_v0 }
  0x2a   :  { %393 = vmatpush3.msra.mxu0 %v255_v37 }
  0xe2   :  { %v132_v5 = vpop.f32.mrf.mxu0 }
  0xe3   :  { %v133_v6 = vadd.f32 %v349_v4, %v132_v5 }
  0xe4   :  { %v374_v7 = vpop.f32.mrf.mxu0 }
  0xe5   :  { %v137_v8 = vsel %vm136_vm2, %v133_v6, 0.0  ;;  %v140_v9 = vmul.f32 %v133_v6, %v133_v6 }
  0xe6   :  { %138 = vadd.xlane.f32.xlu0 %v137_v8 }
  0xe7   :  { %v141_v10 = vsel %vm136_vm2, %v140_v9, 0.0 }
  0xea   :  { %142 = vadd.xlane.f32.xlu0 %v141_v10 }
 0x16f   :  { %v139_v15 = vpop.xlane.xlu0 %138 }
 0x170   :  { %v144_v16 = vmul.f32 0.03125, %v139_v15 }
 0x172   :  { %v146_v18 = vmul.f32 %v144_v16, %v144_v16  ;;  %v149_v23 = vsub.f32 %v133_v6, %v144_v16 }
 0x173   :  { %v143_v17 = vpop.xlane.xlu0 %142 }
 0x174   :  { %v145_v19 = vmul.f32 0.03125, %v143_v17 }
 0x176   :  { %v147_v20 = vsub.f32 %v145_v19, %v146_v18 }
 0x178   :  { %v148_v21 = vmax.f32 %v147_v20, 0.0 }
 0x17a   :  { %v150_v22 = vadd.f32 1e-05, %v148_v21 }
 0x17c   :  { %403 = vrsqrt.f32 %v150_v22 }
 0x189   :  { %v404_v24 = vpop.eup %403 }
 0x18a   :  { %v152_v25 = vmul.f32 %v404_v24, %v149_v23 }
 0x18c   :  { %v153_v26 = vmax.f32 %v152_v25, 0.0 }
 0x18e   :  { %384 = vmatmul.mubr.msk.f32.vlgmr.msra.gmra.mxu1 %vm136_vm2, %v153_v26 }
 0x24e   :  { %v234_v28 = vpop.f32.mrf.mxu1 }
 0x24f   :  { %v235_v29 = vadd.f32 %v351_v27, %v234_v28 }
 0x250   :  { %v385_v30 = vpop.f32.mrf.mxu1 }
 0x251   :  { %v238_v31 = vsel %vm136_vm2, %v235_v29, 0.0  ;;  %v241_v32 = vmul.f32 %v235_v29, %v235_v29 }
 0x252   :  { %239 = vadd.xlane.f32.xlu1 %v238_v31 }
 0x253   :  { %v242_v33 = vsel %vm136_vm2, %v241_v32, 0.0 }
 0x256   :  { %243 = vadd.xlane.f32.xlu1 %v242_v33 }
 0x2db   :  { %v240_v38 = vpop.xlane.xlu1 %239 }
 0x2dc   :  { %v245_v39 = vmul.f32 0.03125, %v240_v38 }
 0x2de   :  { %v247_v41 = vmul.f32 %v245_v39, %v245_v39  ;;  %v250_v46 = vsub.f32 %v235_v29, %v245_v39 }
 0x2df   :  { %v244_v40 = vpop.xlane.xlu1 %243 }
 0x2e0   :  { %v246_v42 = vmul.f32 0.03125, %v244_v40 }
 0x2e2   :  { %v248_v43 = vsub.f32 %v246_v42, %v247_v41 }
 0x2e4   :  { %v249_v44 = vmax.f32 %v248_v43, 0.0 }
 0x2e6   :  { %v251_v45 = vadd.f32 1e-05, %v249_v44 }
 0x2e8   :  { %405 = vrsqrt.f32 %v251_v45 }
 0x2f5   :  { %v406_v47 = vpop.eup %405 }
 0x2f6   :  { %v253_v48 = vmul.f32 %v406_v47, %v250_v46 }
 0x2f8   :  { %v254_v49 = vmax.f32 %v253_v48, 0.0 }
 0x2fa   :  { %395 = vmatmul.mubr.msk.f32.vlgmr.msra.gmra.mxu0 %vm136_vm2, %v254_v49 }
 0x3ba   :  { %v335_v51 = vpop.f32.mrf.mxu0 }
 0x3bb   :  { %v336_v52 = vadd.f32 %v353_v50, %v335_v51 }
 0x3bc   :  { %v396_v53 = vpop.f32.mrf.mxu0 }
 0x3bd   :  { %407 = vtanh.f32 %v336_v52 }
 0x3ca   :  { %v408_v54 = vpop.eup %407 }
 0x3cb   :  { %v340_v55 = vmul.f32 2.0, %v408_v54 }
 0x3cd   :  { %342 = vst.msk [vmem:[%s567_s7] sm:$0xff] %vm341_vm3, %v340_v55 }
 0x3ce   :  { %347 = vsyncpa [#allocation3], 1 }
 0x3cf   :  { %348 = vsyncpa [#allocation5], 1 }

</bundles_post_ra>
